<compile_context>
chip_gen: v7x
topology: tpu7x:2x2x1
jax: 0.10.0
libtpu: 0.0.40
codegen_flags: <defaults>
</compile_context>

<pallas_src>
import jax
import jax.numpy as jnp
from jax import lax
from jax.experimental import pallas as pl
from jax.experimental.pallas import tpu as pltpu


def fold_params(params):
    """Fold the activation-free conv1->conv2->conv3_{kp,f} chain ONCE, offline."""
    w1, b1, w2, b2, w3kp, b3kp, w3f, b3f = params
    w21 = w2 @ w1                                                   # (dim2, HW)
    w_fused = jnp.concatenate([w3kp @ w21, w3f @ w21], axis=0)      # (2*dim2, HW)
    b_mid = w2 @ b1 + b2                                            # (dim2, 1)
    b_fused = jnp.concatenate([w3kp @ b_mid + b3kp,
                               w3f @ b_mid + b3f], axis=0)          # (2*dim2, 1)
    return w_fused, b_fused


def _pick_tile_c(C, HW, n_rows, in_bytes, vmem_budget=24 * 1024 * 1024):
    """Largest lane-aligned C tile whose (double-buffered) working set fits VMEM."""
    def fits(t):
        x_buf = 2 * t * HW * in_bytes            # double-buffered x block
        w_buf = 2 * n_rows * HW * in_bytes       # fused weight (2 pipeline buffers)
        out_buf = 2 * 2 * (n_rows // 2) * t * 4  # two f32 outputs, double-buffered
        tmp = 2 * n_rows * t * 4                 # matmul result + head-split copies
        return x_buf + w_buf + out_buf + tmp <= vmem_budget
    for t in (1024, 512, 256, 128):
        if C % t == 0 and fits(t):
            return t
    # Small / irregular C: one full-width block (block == full dim is legal).
    # TODO(synk): for enormous HW where even this overflows, tile K=HW with an
    # accumulator grid axis.
    return C


def encinp_kernel(x_ref, w_ref, b_ref, kp_ref, f_ref):
    # x_ref : (1, tile_c, HW)   current (batch, C-tile) block of the input
    # w_ref : (2*dim2, HW)      fused weight (constant across the grid)
    # b_ref : (2*dim2, 1)       fused bias, broadcast over the C (lane) axis
    # kp_ref, f_ref : (1, dim2, tile_c) blocks of the (B, dim2, C) outputs
    h = lax.dot_general(                       # (2*dim2, HW) x (tile_c, HW)^T
        w_ref[...], x_ref[0],
        dimension_numbers=(((1,), (1,)), ((), ())),
        preferred_element_type=jnp.float32)    # -> (2*dim2, tile_c), f32 acc
    h = jnp.maximum(h + b_ref[...], 0.0)       # bias + ReLU on both fused heads
    d2 = kp_ref.shape[1]
    kp_ref[0] = h[:d2].astype(kp_ref.dtype)
    f_ref[0] = h[d2:].astype(f_ref.dtype)


def encinp_forward(x_nchw, folded_params, compute_dtype=jnp.float32):
    """x_nchw: (B, C, H, W).  Returns (x_kp, x_f), each (B, dim2, C) float32."""
    w_fused, b_fused = folded_params
    B, C, H, W = x_nchw.shape
    HW = H * W
    two_d2, hw_w = w_fused.shape
    assert hw_w == HW, "fused weight HW must match the input spatial size"
    dim2 = two_d2 // 2

    x3 = x_nchw.reshape(B, C, HW).astype(compute_dtype)   # pure reshape, no transpose
    w = w_fused.astype(compute_dtype)
    b = b_fused.astype(jnp.float32)

    in_bytes = jnp.dtype(compute_dtype).itemsize
    tile_c = _pick_tile_c(C, HW, two_d2, in_bytes)
    grid = (B, C // tile_c)

    flops = 2 * B * C * HW * two_d2
    bytes_accessed = (B * C * HW * in_bytes + two_d2 * HW * in_bytes
                      + two_d2 * 4 + 2 * B * dim2 * C * 4)

    kp, f = pl.pallas_call(
        encinp_kernel,
        out_shape=(jax.ShapeDtypeStruct((B, dim2, C), jnp.float32),
                   jax.ShapeDtypeStruct((B, dim2, C), jnp.float32)),
        grid=grid,
        in_specs=[
            pl.BlockSpec((1, tile_c, HW), lambda bi, ci: (bi, ci, 0)),
            pl.BlockSpec((two_d2, HW), lambda bi, ci: (0, 0)),
            pl.BlockSpec((two_d2, 1), lambda bi, ci: (0, 0)),
        ],
        out_specs=(pl.BlockSpec((1, dim2, tile_c), lambda bi, ci: (bi, 0, ci)),
                   pl.BlockSpec((1, dim2, tile_c), lambda bi, ci: (bi, 0, ci))),
        compiler_params=pltpu.CompilerParams(
            dimension_semantics=("parallel", "parallel"),
            vmem_limit_bytes=32 * 1024 * 1024),
        cost_estimate=pl.CostEstimate(flops=flops, transcendentals=0,
                                      bytes_accessed=bytes_accessed),
    )(x3, w, b)
    return kp, f


def make_params(key, hw, dim1, dim2):
    ks = jax.random.split(key, 8)
    scale = 0.05
    w1 = scale * jax.random.normal(ks[0], (dim1, hw), jnp.float32)
    b1 = scale * jax.random.normal(ks[1], (dim1, 1), jnp.float32)
    w2 = scale * jax.random.normal(ks[2], (dim2, dim1), jnp.float32)
    b2 = scale * jax.random.normal(ks[3], (dim2, 1), jnp.float32)
    w3kp = scale * jax.random.normal(ks[4], (dim2, dim2), jnp.float32)
    b3kp = scale * jax.random.normal(ks[5], (dim2, 1), jnp.float32)
    w3f = scale * jax.random.normal(ks[6], (dim2, dim2), jnp.float32)
    b3f = scale * jax.random.normal(ks[7], (dim2, 1), jnp.float32)
    return (w1, b1, w2, b2, w3kp, b3kp, w3f, b3f)


def encinp_reference(x_nchw, params):
    """Pure-JAX reference mirroring the PyTorch forward (unfused)."""
    B, C, H, W = x_nchw.shape
    x = x_nchw.reshape(B, C, H * W).transpose(0, 2, 1)               # (B, HW, C)
    w1, b1, w2, b2, w3kp, b3kp, w3f, b3f = params
    h1 = jnp.einsum('oi,bic->boc', w1, x) + b1[None]
    h2 = jnp.einsum('oi,bic->boc', w2, h1) + b2[None]
    kp = jax.nn.relu(jnp.einsum('oi,bic->boc', w3kp, h2) + b3kp[None])
    f = jax.nn.relu(jnp.einsum('oi,bic->boc', w3f, h2) + b3f[None])
    return kp, f


if __name__ == "__main__":
    # Small shapes: B=2, feature channels C=8, H=W=4 -> my_height*my_width=16,
    # dim1=32, dim2=16.
    B, C, H, W = 2, 8, 4, 4
    dim1, dim2 = 32, 16

    key = jax.random.PRNGKey(0)
    kx, kparams = jax.random.split(key)
    x = jax.random.normal(kx, (B, C, H, W), jnp.float32)
    params = make_params(kparams, H * W, dim1, dim2)

    # Fold the affine conv chain once (hoisted out of the per-call path).
    folded = fold_params(params)

    # f32 compute path (exact check against the unfused reference).
    kp_out, f_out = encinp_forward(x, folded, compute_dtype=jnp.float32)
    kp_out = jax.block_until_ready(kp_out)
    f_out = jax.block_until_ready(f_out)

    kp_ref, f_ref = encinp_reference(x, params)
    assert kp_out.shape == (B, dim2, C) and f_out.shape == (B, dim2, C)
    assert jnp.allclose(kp_out, kp_ref, atol=1e-5, rtol=1e-5)
    assert jnp.allclose(f_out, f_ref, atol=1e-5, rtol=1e-5)

    # bf16 compute path (recommended production default on v5e/v6e/v7x):
    # same kernel, inputs/weights cast at the boundary, f32 accumulation.
    kp_bf, f_bf = encinp_forward(x, folded, compute_dtype=jnp.bfloat16)
    kp_bf = jax.block_until_ready(kp_bf)
    f_bf = jax.block_until_ready(f_bf)
    assert jnp.allclose(kp_bf, kp_ref, atol=2e-2, rtol=2e-2)
    assert jnp.allclose(f_bf, f_ref, atol=2e-2, rtol=2e-2)

    print("KERNEL_OK")
</pallas_src>

<mosaic_0001>
module attributes {stable_mosaic.version = 11 : i64} {
  func.func @encinp_kernel(%arg0: i32, %arg1: i32, %arg2: memref<1x8x16xf32, #tpu.memory_space<vmem>>, %arg3: memref<32x16xf32, #tpu.memory_space<vmem>>, %arg4: memref<32x1xf32, #tpu.memory_space<vmem>>, %arg5: memref<1x16x8xf32, #tpu.memory_space<vmem>>, %arg6: memref<1x16x8xf32, #tpu.memory_space<vmem>>) attributes {dimension_semantics = [#tpu.dimension_semantics<parallel>, #tpu.dimension_semantics<parallel>], iteration_bounds = array<i64: 2, 1>, scalar_prefetch = 0 : i64, scratch_operands = 0 : i64, tpu.core_type = #tpu.core_type<tc>, window_params = [{transform_indices = @transform_0, window_bounds = array<i64: 1, 8, 16>}, {pipeline_mode = #tpu.pipeline_mode<synchronous>, transform_indices = @transform_1, window_bounds = array<i64: 32, 16>}, {pipeline_mode = #tpu.pipeline_mode<synchronous>, transform_indices = @transform_2, window_bounds = array<i64: 32, 1>}, {transform_indices = @transform_3, window_bounds = array<i64: 1, 16, 8>}, {transform_indices = @transform_4, window_bounds = array<i64: 1, 16, 8>}]} {
    %c0 = arith.constant 0 : index
    %c0_0 = arith.constant 0 : index
    %0 = vector.load %arg3[%c0, %c0_0] : memref<32x16xf32, #tpu.memory_space<vmem>>, vector<32x16xf32>
    %c0_1 = arith.constant 0 : index
    %c0_2 = arith.constant 0 : index
    %c0_3 = arith.constant 0 : index
    %1 = vector.load %arg2[%c0_1, %c0_2, %c0_3] : memref<1x8x16xf32, #tpu.memory_space<vmem>>, vector<1x8x16xf32>
    %2 = vector.shape_cast %1 : vector<1x8x16xf32> to vector<8x16xf32>
    %cst = arith.constant dense<0.000000e+00> : vector<32x8xf32>
    %3 = tpu.matmul %0, %2, %cst {dimension_numbers = #tpu.dot_dimension_numbers<[1], [1], [0], [0], [0, 0, 1, 0], [], []>} : vector<32x16xf32>, vector<8x16xf32>, vector<32x8xf32> -> vector<32x8xf32>
    %c0_4 = arith.constant 0 : index
    %c0_5 = arith.constant 0 : index
    %4 = vector.load %arg4[%c0_4, %c0_5] : memref<32x1xf32, #tpu.memory_space<vmem>>, vector<32x1xf32>
    %5 = vector.broadcast %4 : vector<32x1xf32> to vector<32x8xf32>
    %6 = arith.addf %3, %5 : vector<32x8xf32>
    %cst_6 = arith.constant 0.000000e+00 : f32
    %7 = vector.broadcast %cst_6 : f32 to vector<32x8xf32>
    %8 = arith.maximumf %6, %7 : vector<32x8xf32>
    %9 = vector.extract_strided_slice %8 {offsets = [0, 0], sizes = [16, 8], strides = [1, 1]} : vector<32x8xf32> to vector<16x8xf32>
    %c0_7 = arith.constant 0 : index
    %c0_8 = arith.constant 0 : index
    %c0_9 = arith.constant 0 : index
    %10 = vector.load %arg5[%c0_7, %c0_8, %c0_9] : memref<1x16x8xf32, #tpu.memory_space<vmem>>, vector<1x16x8xf32>
    %11 = vector.shape_cast %10 : vector<1x16x8xf32> to vector<16x8xf32>
    %12 = vector.shape_cast %9 : vector<16x8xf32> to vector<1x16x8xf32>
    tpu.vector_store %arg5[%c0_7, %c0_8, %c0_9], %12 {strides = array<i32>} : memref<1x16x8xf32, #tpu.memory_space<vmem>>, vector<1x16x8xf32>,
    %13 = vector.extract_strided_slice %8 {offsets = [16, 0], sizes = [16, 8], strides = [1, 1]} : vector<32x8xf32> to vector<16x8xf32>
    %c0_10 = arith.constant 0 : index
    %c0_11 = arith.constant 0 : index
    %c0_12 = arith.constant 0 : index
    %14 = vector.load %arg6[%c0_10, %c0_11, %c0_12] : memref<1x16x8xf32, #tpu.memory_space<vmem>>, vector<1x16x8xf32>
    %15 = vector.shape_cast %14 : vector<1x16x8xf32> to vector<16x8xf32>
    %16 = vector.shape_cast %13 : vector<16x8xf32> to vector<1x16x8xf32>
    tpu.vector_store %arg6[%c0_10, %c0_11, %c0_12], %16 {strides = array<i32>} : memref<1x16x8xf32, #tpu.memory_space<vmem>>, vector<1x16x8xf32>,
    return
  }
  func.func @transform_0(%arg0: i32, %arg1: i32) -> (i32, i32, i32) {
    %c0_i32 = arith.constant 0 : i32
    %c0_i32_0 = arith.constant 0 : i32
    return %arg0, %arg1, %c0_i32 : i32, i32, i32
  }
  func.func @transform_1(%arg0: i32, %arg1: i32) -> (i32, i32) {
    %c0_i32 = arith.constant 0 : i32
    %c0_i32_0 = arith.constant 0 : i32
    %c0_i32_1 = arith.constant 0 : i32
    return %c0_i32, %c0_i32_0 : i32, i32
  }
  func.func @transform_2(%arg0: i32, %arg1: i32) -> (i32, i32) {
    %c0_i32 = arith.constant 0 : i32
    %c0_i32_0 = arith.constant 0 : i32
    %c0_i32_1 = arith.constant 0 : i32
    return %c0_i32, %c0_i32_0 : i32, i32
  }
  func.func @transform_3(%arg0: i32, %arg1: i32) -> (i32, i32, i32) {
    %c0_i32 = arith.constant 0 : i32
    %c0_i32_0 = arith.constant 0 : i32
    return %arg0, %c0_i32, %arg1 : i32, i32, i32
  }
  func.func @transform_4(%arg0: i32, %arg1: i32) -> (i32, i32, i32) {
    %c0_i32 = arith.constant 0 : i32
    %c0_i32_0 = arith.constant 0 : i32
    return %arg0, %c0_i32, %arg1 : i32, i32, i32
  }
}

</mosaic_0001>

<bundles_post_ra>
// kernel: tpu_custom_call.1
= control target key start
LH: loop header
LB: loop body
LE: loop exit
PB: predicated region body
PF: predicated region fallthrough
CT: control target
= control target key end

     0   :  { %s624_s15 = smov 0   ;;  %s626_s16 = smov 0   ;;  %s696_s0 = inlined_call_operand.vmem [shape: f32[2,8,16], index: 0, kind: input, shape index: {}]   ;;  %s697_s1 = inlined_call_operand.vmem [shape: f32[32,16], index: 1, kind: input, shape index: {}]   ;;  %s698_s2 = inlined_call_operand.vmem [shape: f32[32,1], index: 2, kind: input, shape index: {}]   ;;  %s699_s3 = inlined_call_operand.vmem [shape: f32[2,16,8], index: 3, kind: output, shape index: {0}]   ;;  %s700_s4 = inlined_call_operand.vmem [shape: f32[2,16,8], index: 4, kind: output, shape index: {1}]  }
   0x1   :  { %s628_s17 = smov 0  }
   0x2 LB: > { %s27_s18 = sadd.s32 1, %s592_s16  ;;  %p517_p0 = scmp.ge.s32.totalorder %s596_s17, 1  ;;  %s596_s17 = sphi %s628_s17, %s15_s17   ;;  %s592_s16 = sphi %s626_s16, %s702_s16   ;;  %s588_s15 = sphi %s624_s15, %s701_s15  }
   0x3   : > { %p29_p1 = scmp.ge.s32.totalorder %s27_s18, 2  ;;  %p185_p2 = scmp.lt.s32.totalorder %s596_s17, 3 }
   0x5   : > { %s704_s18 = smov (%p29_p1, %s27_s18), 0  ;;  %p186_p3 = pnand %p517_p0, %p185_p2 }
   0x6   : > { %p224_p4 = scmp.lt.s32.totalorder (!%p186_p3), %s588_s15, 1  ;;  %vm276_vm0 = vcmask (!%p186_p3), 130048   ;;  %v247_v0 = vld [vmem:[%s697_s1] sm:$0xff] (!%p186_p3)  ;;  %v249_v1 = vld [vmem:[%s697_s1 + $0x10] sm:$0xff] (!%p186_p3)  ;;  %v598_v4 = vmov (!%p186_p3), 0   ;;  %v255_v6 = vld [vmem:[%s698_s2 + $0x18] sm:$0xff] (!%p186_p3) }
   0x7   : > { %189 = sbr.rel (%p186_p3) target bundleno = 240 (0xf0), region = 32  ;;  %539 = vmatprep.mubr.msk.f32.mxu0 (!%p186_p3), %vm276_vm0, %v247_v0  ;;  %542 = vmatprep.mubr.msk.f32.mxu1 (!%p186_p3), %vm276_vm0, %v249_v1  ;;  %v254_v2 = vld [vmem:[%s698_s2 + $0x10] sm:$0xff] (!%p186_p3)  ;;  %v252_v3 = vld [vmem:[%s698_s2] sm:$0xff] (!%p186_p3)  ;;  %v253_v7 = vld [vmem:[%s698_s2 + $0x8] sm:$0xff] (!%p186_p3)  ;;  %vm381_vm1 = vcmask (!%p186_p3), 64512  }
   0x8   : > { %573 = vset.pattern.permute.xlu1 (!%p186_p3), %v598_v4  ;;  %572 = vset.pattern.permute.xlu0 (!%p186_p3), %v598_v4  ;;  %v248_v8 = vld [vmem:[%s697_s1 + $0x8] sm:$0xff] (!%p186_p3)  ;;  %v250_v9 = vld [vmem:[%s697_s1 + $0x18] sm:$0xff] (!%p186_p3) }
   0x9   : > { %268 = vperm.xlu1 (!%p186_p3), %573, %v254_v2   ;;  %258 = vperm.xlu0 (!%p186_p3), %572, %v252_v3  }
   0xd   : > { %273 = vperm.xlu1 (!%p186_p3), %573, %v255_v6   ;;  %263 = vperm.xlu0 (!%p186_p3), %572, %v253_v7  }
   0xe   : > { %s706_s15 = smov (!%p224_p4, %s588_s15), 1 }
   0xf   : > { %s518_s27 = sshll.u32 %s706_s15, 3  ;;  %s530_s13 = sshll.u32 %s706_s15, 4 }
  0x10   : > { %s230_s30 = scalar_lea.vmem %s696_s0, %s518_s27  ;;  %s238_s20 = scalar_lea.vmem %s699_s3, %s530_s13 }
  0x11   : > { %v251_v5 = vld [vmem:[%s230_s30] sm:$0xff]  ;;  %s246_s23 = scalar_lea.vmem %s700_s4, %s530_s13 }
  0x12   : > { %537 = vmatprep.subr.msk.mxu0 %vm276_vm0, %v251_v5  ;;  %545 = vmatprep.subr.msk.mxu1 %vm276_vm0, %v251_v5 }
  0x13   : > { %538 = vmatpush3.xpose.msk.msra.mxu0 %vm276_vm0, %v251_v5  ;;  %546 = vmatpush3.xpose.msk.msra.mxu1 %vm276_vm0, %v251_v5 }
  0x16   : > { %540 = vmatmul.mubr.msk.f32.vlgmr.msra.gmra.mrb[0].mxu0 %vm276_vm0, %v248_v8  ;;  %543 = vmatmul.mubr.msk.f32.vlgmr.msra.gmra.mrb[0].mxu1 %vm276_vm0, %v250_v9 }
  0x88   : > { %v269_v10 = vpop.permute.xlu1 %268  ;;  %v259_v11 = vpop.permute.xlu0 %258 }
  0x8c   : > { %v274_v12 = vpop.permute.xlu1 %273  ;;  %v264_v13 = vpop.permute.xlu0 %263 }
  0xe9   : > { %v541_v14 = vpop.f32.mrb[0].mxu0  ;;  %v544_v15 = vpop.f32.mrb[0].mxu1 }
  0xea   : > { %v364_v16 = vadd.f32 %v541_v14, %v264_v13  ;;  %v374_v17 = vadd.f32 %v544_v15, %v274_v12  ;;  %v358_v18 = vpop.f32.mrb[1].mxu0  ;;  %v368_v19 = vpop.f32.mrb[1].mxu1 }
  0xeb   : > { %v359_v20 = vadd.f32 %v358_v18, %v259_v11  ;;  %v369_v21 = vadd.f32 %v368_v19, %v269_v10 }
  0xec   : > { %v378_v22 = vmax.f32 %v364_v16, 0.0  ;;  %v380_v23 = vmax.f32 %v374_v17, 0.0 }
  0xed   : > { %v377_v24 = vmax.f32 %v359_v20, 0.0  ;;  %v379_v25 = vmax.f32 %v369_v21, 0.0 }
  0xee   : > { %383 = vst.msk [vmem:[%s238_s20 + $0x8] sm:$0xff] %vm381_vm1, %v378_v22  ;;  %385 = vst.msk [vmem:[%s246_s23 + $0x8] sm:$0xff] %vm381_vm1, %v380_v23 }
  0xef   : > { %382 = vst.msk [vmem:[%s238_s20] sm:$0xff] %vm381_vm1, %v377_v24  ;;  %384 = vst.msk [vmem:[%s246_s23] sm:$0xff] %vm381_vm1, %v379_v25 }
  0xf0 PF: > { %s15_s17 = sadd.s32 1, %s596_s17   ;;  %s701_s15 = smov %s592_s16 }
  0xf1   : > { %p12_p5 = scmp.ge.s32.totalorder %s15_s17, 4   ;;  %s702_s16 = smov %s704_s18 }
  0xf3   :  { %14 = sbr.rel (!%p12_p5) target bundleno = 2 (0x2), region = 74 }

</bundles_post_ra>
